<compile_context>
chip_gen: v7x
topology: tpu7x:2x2x1
jax: 0.10.0
libtpu: 0.0.40
codegen_flags: <defaults>
</compile_context>

<pallas_src>
import math

import jax
import jax.numpy as jnp
from jax.experimental import pallas as pl
from jax.experimental.pallas import tpu as pltpu


# ----------------------------- Pallas kernel -------------------------------
def critic_kernel(x_ref, w1_ref, b1_ref, w2_ref, b2_ref, w3_ref, b3_ref, q_ref):
    """Fused 3-layer MLP forward, batch-in-lanes / feature-major.

    x_ref  : (D, TB)   feature-major batch tile of concat([state, action], 1)
    w1     : (64, D)   merged l1 weight (PyTorch (out, in) layout), compute dtype
    b1     : (64, 1)   f32
    w2     : (32, 64)  f32   b2: (32, 1) f32
    w3     : (1, 32)   f32   b3: (1, 1)  f32
    q_ref  : (1, TB)   lane-dense output tile (batch along lanes), f32
    """
    # Layer 1: (64, D) @ (D, TB) -> (64, TB), f32 accumulation on the MXU.
    h1 = jnp.dot(w1_ref[...], x_ref[...], preferred_element_type=jnp.float32)
    h1 = jnp.maximum(h1 + b1_ref[...], 0.0)                       # (64, TB)

    # Layer 2: (32, 64) @ (64, TB) -> (32, TB).
    h2 = jnp.dot(w2_ref[...], h1, preferred_element_type=jnp.float32)
    h2 = jnp.maximum(h2 + b2_ref[...], 0.0)                       # (32, TB)

    # Layer 3: (1, 32) @ (32, TB) -> (1, TB): full-lane-width store.
    q = jnp.dot(w3_ref[...], h2, preferred_element_type=jnp.float32)
    q_ref[...] = (q + b3_ref[...]).astype(q_ref.dtype)            # (1, TB)


# --------------------------- hardware heuristics ----------------------------
def _num_tensorcores():
    """Best-effort TensorCore count per JAX device (affects step count only)."""
    try:
        kind = jax.devices()[0].device_kind.lower()
    except Exception:
        return 1
    # v7x and the v4/v5p megacore chips expose 2 TCs behind one device.
    if any(tag in kind for tag in ("v7", "7x", "v5p", "v4")):
        return 2
    return 1


# ------------------------------- wrapper ------------------------------------
def critic_forward(state, action, params, *,
                   compute_dtype=jnp.bfloat16,
                   max_tile_rows=32768,
                   vmem_budget_bytes=20 * 1024 * 1024):
    """Fused Critic MLP as a single pallas_call, tiled over the batch."""
    w1, b1, w2, b2, w3, b3 = params
    B, S = state.shape
    A = action.shape[1]
    D = S + A
    LANE = 128

    in_itemsize = jnp.dtype(compute_dtype).itemsize

    # Per-batch-row VMEM estimate (double-buffered input/output blocks plus
    # layer-1/2 intermediates), used to size the tile against a budget that
    # stays well under every generation's default scoped-VMEM limit.
    bytes_per_row = (2 * D * in_itemsize   # x block, double-buffered
                     + 2 * 8 * 4           # (1, TB) out block (sublane-padded), x2
                     + 2 * 64 * 4          # h1 live copies (pre/post ReLU)
                     + 2 * 32 * 4)         # h2 live copies
    max_tile_lanes = max(1, min(max_tile_rows,
                                vmem_budget_bytes // bytes_per_row) // LANE)

    lanes = pl.cdiv(B, LANE)                       # 128-row lane groups
    steps = pl.cdiv(lanes, max_tile_lanes)
    num_tc = _num_tensorcores()
    if num_tc > 1 and lanes >= num_tc:
        # Balance work across TensorCores: multiple-of-num_tc step count.
        steps = max(steps, num_tc)
        steps = -(-steps // num_tc) * num_tc
    tile_lanes = pl.cdiv(lanes, steps)
    tile_b = tile_lanes * LANE
    b_pad = steps * tile_b

    # Feature-major activation: one fused pad + concat + transpose in XLA.
    x = jnp.concatenate([state.astype(compute_dtype),
                         action.astype(compute_dtype)], axis=1)   # (B, D)
    if b_pad != B:
        x = jnp.pad(x, ((0, b_pad - B), (0, 0)))
    x = x.T                                                       # (D, b_pad)

    w1c = w1.astype(compute_dtype)                                # (64, D)

    # Full-array blocks with constant index_map: weights/biases stay resident
    # in VMEM across all grid steps (the pipeline revisits the same block).
    def full(arr):
        return pl.BlockSpec(arr.shape, lambda *_: (0,) * arr.ndim)

    operands = (x, w1c, b1, w2, b2, w3, b3)
    bytes_accessed = sum(int(o.size) * jnp.dtype(o.dtype).itemsize
                         for o in operands) + b_pad * 4
    cost = pl.CostEstimate(
        flops=2 * b_pad * (D * 64 + 64 * 32 + 32 * 1),
        transcendentals=0,
        bytes_accessed=int(bytes_accessed),
    )

    q_t = pl.pallas_call(
        critic_kernel,
        out_shape=jax.ShapeDtypeStruct((1, b_pad), jnp.float32),
        grid_spec=pltpu.PrefetchScalarGridSpec(
            num_scalar_prefetch=0,
            grid=(steps,),
            in_specs=[
                pl.BlockSpec((D, tile_b), lambda i: (0, i)),      # x tile
                full(w1c), full(b1),
                full(w2), full(b2),
                full(w3), full(b3),
            ],
            out_specs=pl.BlockSpec((1, tile_b), lambda i: (0, i)),
        ),
        compiler_params=pltpu.CompilerParams(
            dimension_semantics=("parallel",),
            vmem_limit_bytes=32 * 1024 * 1024,
        ),
        cost_estimate=cost,
    )(*operands)

    return q_t[0, :B].reshape(B, 1)


# ------------------------- deterministic init -------------------------------
def xavier_uniform(key, fan_out, fan_in, gain=1.0):
    # Matches torch.nn.init.xavier_uniform_ (gain=1); PyTorch (out, in) layout.
    bound = gain * math.sqrt(6.0 / (fan_in + fan_out))
    return jax.random.uniform(
        key, (fan_out, fan_in), dtype=jnp.float32, minval=-bound, maxval=bound
    )


def init_critic_params(key, state_dim, action_dim):
    k1, k2, k3 = jax.random.split(key, 3)
    d = state_dim + action_dim
    w1 = xavier_uniform(k1, 64, d)            # (64, S+A), PyTorch (out, in)
    b1 = jnp.zeros((64, 1), jnp.float32)      # constant(bias, 0)
    w2 = xavier_uniform(k2, 32, 64)
    b2 = jnp.zeros((32, 1), jnp.float32)
    w3 = xavier_uniform(k3, 1, 32)
    b3 = jnp.zeros((1, 1), jnp.float32)
    return (w1, b1, w2, b2, w3, b3)


def critic_ref(state, action, params):
    """Pure-JAX f32 reference (mirrors the PyTorch forward exactly)."""
    w1, b1, w2, b2, w3, b3 = params
    x = jnp.concatenate([state, action], axis=1)
    h1 = jnp.maximum(x @ w1.T + b1[:, 0], 0.0)
    h2 = jnp.maximum(h1 @ w2.T + b2[:, 0], 0.0)
    return h2 @ w3.T + b3[:, 0]


# --------------------------------- main --------------------------------------
if __name__ == "__main__":
    state_dim, action_dim = 12, 4

    key = jax.random.PRNGKey(0)
    kp, ks, ka, ks2, ka2 = jax.random.split(key, 5)
    params = init_critic_params(kp, state_dim, action_dim)

    # Small batch (single grid step, padded to one 128-row lane group).
    batch = 8
    state = jax.random.normal(ks, (batch, state_dim), dtype=jnp.float32)
    action = jax.random.normal(ka, (batch, action_dim), dtype=jnp.float32)
    q_ref = critic_ref(state, action, params)

    # Default bf16 layer-1 operands (f32 accumulation).
    q_bf16 = jax.block_until_ready(critic_forward(state, action, params))
    assert q_bf16.shape == (batch, 1)
    assert jnp.allclose(q_bf16, q_ref, atol=5e-2, rtol=5e-2), "mismatch (bf16, batch=8)"

    # f32-parity path.
    q_f32 = jax.block_until_ready(
        critic_forward(state, action, params, compute_dtype=jnp.float32))
    assert q_f32.shape == (batch, 1)
    assert jnp.allclose(q_f32, q_ref, atol=1e-4, rtol=1e-4), "mismatch (f32, batch=8)"

    # Non-multiple-of-128 batch: exercises padding and the multi-TC step split.
    batch2 = 300
    state2 = jax.random.normal(ks2, (batch2, state_dim), dtype=jnp.float32)
    action2 = jax.random.normal(ka2, (batch2, action_dim), dtype=jnp.float32)
    q2 = jax.block_until_ready(critic_forward(state2, action2, params))
    q2_ref = critic_ref(state2, action2, params)
    assert q2.shape == (batch2, 1)
    assert jnp.allclose(q2, q2_ref, atol=5e-2, rtol=5e-2), "mismatch (bf16, batch=300)"

    print("KERNEL_OK")
</pallas_src>

<mosaic_0001>
module attributes {stable_mosaic.version = 11 : i64} {
  func.func @critic_kernel(%arg0: i32, %arg1: memref<16x128xbf16, #tpu.memory_space<vmem>>, %arg2: memref<64x16xbf16, #tpu.memory_space<vmem>>, %arg3: memref<64x1xf32, #tpu.memory_space<vmem>>, %arg4: memref<32x64xf32, #tpu.memory_space<vmem>>, %arg5: memref<32x1xf32, #tpu.memory_space<vmem>>, %arg6: memref<1x32xf32, #tpu.memory_space<vmem>>, %arg7: memref<1x1xf32, #tpu.memory_space<vmem>>, %arg8: memref<1x128xf32, #tpu.memory_space<vmem>>) attributes {dimension_semantics = [#tpu.dimension_semantics<parallel>], iteration_bounds = array<i64: 1>, scalar_prefetch = 0 : i64, scratch_operands = 0 : i64, tpu.core_type = #tpu.core_type<tc>, window_params = [{transform_indices = @transform_0, window_bounds = array<i64: 16, 128>}, {pipeline_mode = #tpu.pipeline_mode<synchronous>, transform_indices = @transform_1, window_bounds = array<i64: 64, 16>}, {pipeline_mode = #tpu.pipeline_mode<synchronous>, transform_indices = @transform_2, window_bounds = array<i64: 64, 1>}, {pipeline_mode = #tpu.pipeline_mode<synchronous>, transform_indices = @transform_3, window_bounds = array<i64: 32, 64>}, {pipeline_mode = #tpu.pipeline_mode<synchronous>, transform_indices = @transform_4, window_bounds = array<i64: 32, 1>}, {pipeline_mode = #tpu.pipeline_mode<synchronous>, transform_indices = @transform_5, window_bounds = array<i64: 1, 32>}, {pipeline_mode = #tpu.pipeline_mode<synchronous>, transform_indices = @transform_6, window_bounds = array<i64: 1, 1>}, {transform_indices = @transform_7, window_bounds = array<i64: 1, 128>}]} {
    %c0 = arith.constant 0 : index
    %c0_0 = arith.constant 0 : index
    %0 = vector.load %arg2[%c0, %c0_0] : memref<64x16xbf16, #tpu.memory_space<vmem>>, vector<64x16xbf16>
    %c0_1 = arith.constant 0 : index
    %c0_2 = arith.constant 0 : index
    %1 = vector.load %arg1[%c0_1, %c0_2] : memref<16x128xbf16, #tpu.memory_space<vmem>>, vector<16x128xbf16>
    %cst = arith.constant dense<0.000000e+00> : vector<64x128xf32>
    %2 = tpu.matmul %0, %1, %cst {dimension_numbers = #tpu.dot_dimension_numbers<[1], [0], [0], [1], [0, 0, 1, 1], [], []>} : vector<64x16xbf16>, vector<16x128xbf16>, vector<64x128xf32> -> vector<64x128xf32>
    %c0_3 = arith.constant 0 : index
    %c0_4 = arith.constant 0 : index
    %3 = vector.load %arg3[%c0_3, %c0_4] : memref<64x1xf32, #tpu.memory_space<vmem>>, vector<64x1xf32>
    %4 = vector.broadcast %3 : vector<64x1xf32> to vector<64x128xf32>
    %5 = arith.addf %2, %4 : vector<64x128xf32>
    %cst_5 = arith.constant 0.000000e+00 : f32
    %6 = vector.broadcast %cst_5 : f32 to vector<64x128xf32>
    %7 = arith.maximumf %5, %6 : vector<64x128xf32>
    %c0_6 = arith.constant 0 : index
    %c0_7 = arith.constant 0 : index
    %8 = vector.load %arg4[%c0_6, %c0_7] : memref<32x64xf32, #tpu.memory_space<vmem>>, vector<32x64xf32>
    %cst_8 = arith.constant dense<0.000000e+00> : vector<32x128xf32>
    %9 = tpu.matmul %8, %7, %cst_8 {dimension_numbers = #tpu.dot_dimension_numbers<[1], [0], [0], [1], [0, 0, 1, 1], [], []>} : vector<32x64xf32>, vector<64x128xf32>, vector<32x128xf32> -> vector<32x128xf32>
    %c0_9 = arith.constant 0 : index
    %c0_10 = arith.constant 0 : index
    %10 = vector.load %arg5[%c0_9, %c0_10] : memref<32x1xf32, #tpu.memory_space<vmem>>, vector<32x1xf32>
    %11 = vector.broadcast %10 : vector<32x1xf32> to vector<32x128xf32>
    %12 = arith.addf %9, %11 : vector<32x128xf32>
    %cst_11 = arith.constant 0.000000e+00 : f32
    %13 = vector.broadcast %cst_11 : f32 to vector<32x128xf32>
    %14 = arith.maximumf %12, %13 : vector<32x128xf32>
    %c0_12 = arith.constant 0 : index
    %c0_13 = arith.constant 0 : index
    %15 = vector.load %arg6[%c0_12, %c0_13] : memref<1x32xf32, #tpu.memory_space<vmem>>, vector<1x32xf32>
    %cst_14 = arith.constant dense<0.000000e+00> : vector<1x128xf32>
    %16 = tpu.matmul %15, %14, %cst_14 {dimension_numbers = #tpu.dot_dimension_numbers<[1], [0], [0], [1], [0, 0, 1, 1], [], []>} : vector<1x32xf32>, vector<32x128xf32>, vector<1x128xf32> -> vector<1x128xf32>
    %c0_15 = arith.constant 0 : index
    %c0_16 = arith.constant 0 : index
    %17 = vector.load %arg7[%c0_15, %c0_16] : memref<1x1xf32, #tpu.memory_space<vmem>>, vector<1x1xf32>
    %18 = vector.broadcast %17 : vector<1x1xf32> to vector<1x128xf32>
    %19 = arith.addf %16, %18 : vector<1x128xf32>
    %c0_17 = arith.constant 0 : index
    %c0_18 = arith.constant 0 : index
    %20 = vector.load %arg8[%c0_17, %c0_18] : memref<1x128xf32, #tpu.memory_space<vmem>>, vector<1x128xf32>
    tpu.vector_store %arg8[%c0_17, %c0_18], %19 {strides = array<i32>} : memref<1x128xf32, #tpu.memory_space<vmem>>, vector<1x128xf32>,
    return
  }
  func.func @transform_0(%arg0: i32) -> (i32, i32) {
    %c0_i32 = arith.constant 0 : i32
    %c0_i32_0 = arith.constant 0 : i32
    return %c0_i32, %arg0 : i32, i32
  }
  func.func @transform_1(%arg0: i32) -> (i32, i32) {
    %c0_i32 = arith.constant 0 : i32
    %c0_i32_0 = arith.constant 0 : i32
    %c0_i32_1 = arith.constant 0 : i32
    return %c0_i32, %c0_i32_0 : i32, i32
  }
  func.func @transform_2(%arg0: i32) -> (i32, i32) {
    %c0_i32 = arith.constant 0 : i32
    %c0_i32_0 = arith.constant 0 : i32
    %c0_i32_1 = arith.constant 0 : i32
    return %c0_i32, %c0_i32_0 : i32, i32
  }
  func.func @transform_3(%arg0: i32) -> (i32, i32) {
    %c0_i32 = arith.constant 0 : i32
    %c0_i32_0 = arith.constant 0 : i32
    %c0_i32_1 = arith.constant 0 : i32
    return %c0_i32, %c0_i32_0 : i32, i32
  }
  func.func @transform_4(%arg0: i32) -> (i32, i32) {
    %c0_i32 = arith.constant 0 : i32
    %c0_i32_0 = arith.constant 0 : i32
    %c0_i32_1 = arith.constant 0 : i32
    return %c0_i32, %c0_i32_0 : i32, i32
  }
  func.func @transform_5(%arg0: i32) -> (i32, i32) {
    %c0_i32 = arith.constant 0 : i32
    %c0_i32_0 = arith.constant 0 : i32
    %c0_i32_1 = arith.constant 0 : i32
    return %c0_i32, %c0_i32_0 : i32, i32
  }
  func.func @transform_6(%arg0: i32) -> (i32, i32) {
    %c0_i32 = arith.constant 0 : i32
    %c0_i32_0 = arith.constant 0 : i32
    %c0_i32_1 = arith.constant 0 : i32
    return %c0_i32, %c0_i32_0 : i32, i32
  }
  func.func @transform_7(%arg0: i32) -> (i32, i32) {
    %c0_i32 = arith.constant 0 : i32
    %c0_i32_0 = arith.constant 0 : i32
    return %c0_i32, %arg0 : i32, i32
  }
}

</mosaic_0001>

<bundles_post_ra>
// kernel: tpu_custom_call.1
= control target key start
LH: loop header
LB: loop body
LE: loop exit
PB: predicated region body
PF: predicated region fallthrough
CT: control target
= control target key end

     0   :  { %s701_s0 = inlined_call_operand.vmem [shape: bf16[16,128], index: 0, kind: input, shape index: {}]   ;;  %s702_s1 = inlined_call_operand.vmem [shape: bf16[64,16], index: 1, kind: input, shape index: {}]   ;;  %s703_s2 = inlined_call_operand.vmem [shape: f32[64,1], index: 2, kind: input, shape index: {}]   ;;  %s704_s3 = inlined_call_operand.vmem [shape: f32[32,64], index: 3, kind: input, shape index: {}]   ;;  %s705_s4 = inlined_call_operand.vmem [shape: f32[32,1], index: 4, kind: input, shape index: {}]   ;;  %s706_s5 = inlined_call_operand.vmem [shape: f32[1,32], index: 5, kind: input, shape index: {}]   ;;  %s707_s6 = inlined_call_operand.<no memory space> [shape: f32[1,1], index: 6, kind: input, shape index: {}]   ;;  %s708_s7 = inlined_call_operand.hbm [shape: f32[1,128], index: 7, kind: output, shape index: {}]  }
   0x1   :  { %v12_v0 = vstv %s707_s6 }
   0x2   :  { %13 = vst [vmem:[#allocation2] sm:$0x1] %v12_v0 }
   0x3   :  { %v538_v1 = vld [vmem:[%s701_s0] sm:$0xff]   ;;  %vm114_vm0 = vcmask 130048   ;;  %v540_v3 = vld [vmem:[%s702_s1 + $0x8] sm:$0xff]   ;;  %v567_v4 = vmov 0   ;;  %v541_v5 = vld [vmem:[%s702_s1 + $0x10] sm:$0xff]  }
   0x4   :  { %v539_v2 = vld [vmem:[%s702_s1] sm:$0xff]   ;;  %466 = vmatprep.subr.bf16.mxu0 %v538_v1  ;;  %536 = vset.pattern.permute.xlu0 %v567_v4  ;;  %v42_v7 = vld [vmem:[%s703_s2 + $0x10] sm:$0xff]  ;;  %v41_v8 = vld [vmem:[%s703_s2 + $0x8] sm:$0xff] }
   0x5   :  { %467 = vmatpush3.bf16.msra.mxu0 %v538_v1  ;;  %468 = vmatprep.mubr.msk.bf16.mxu0 %vm114_vm0, %v539_v2  ;;  %v40_v6 = vld [vmem:[%s703_s2] sm:$0xff]  ;;  %v43_v9 = vld [vmem:[%s703_s2 + $0x18] sm:$0xff] }
   0x6   :  { %537 = vset.pattern.permute.xlu1 %v567_v4  ;;  %50 = vperm.xlu0 %536, %v40_v6  }
   0x7   :  { %60 = vperm.xlu1 %537, %v42_v7  }
   0x8   :  { %469 = vmatmul.mubr.msk.bf16.vlgmr.msra.gmra.mrb[0].mxu0 %vm114_vm0, %v540_v3 }
   0x9   :  { %472 = vmatprep.mubr.msk.bf16.mxu0 %vm114_vm0, %v541_v5 }
   0xa   :  { %14 = vsyncpa [#allocation4], 0  ;;  %v542_v10 = vld [vmem:[%s702_s1 + $0x18] sm:$0xff]   ;;  %55 = vperm.xlu0 %536, %v41_v8   ;;  %v44_v11 = vld [vmem:[%s703_s2 + $0x20] sm:$0xff]  ;;  %vm228_vm1 = vcmask 523264   ;;  %v568_v60 = vmov 0.0|0.0  }
   0xb   :  { %65 = vperm.xlu1 %537, %v43_v9   ;;  %v45_v12 = vld [vmem:[%s703_s2 + $0x28] sm:$0xff]  ;;  %v46_v13 = vld [vmem:[%s703_s2 + $0x30] sm:$0xff]  ;;  %v47_v14 = vld [vmem:[%s703_s2 + $0x38] sm:$0xff]  ;;  %525 = vmatprep.subr.bf16.mxu0 %v568_v60  ;;  %vm569_vm2 = vmmov 0   ;;  %v570_v61 = vmov 0.0   ;;  %vm341_vm3 = vcmask 261120  }
   0xc   :  { %v204_v15 = vld [vmem:[%s705_s4] sm:$0xff]  ;;  %v205_v16 = vld [vmem:[%s705_s4 + $0x8] sm:$0xff]  ;;  %v206_v17 = vld [vmem:[%s705_s4 + $0x10] sm:$0xff]  ;;  %s571_s16 = smov [#allocation3]  }
   0xd   :  { %v207_v18 = vld [vmem:[%s705_s4 + $0x18] sm:$0xff]  ;;  %v331_v19 = vld [vmem:[#allocation2] sm:$0x1]  ;;  %v201_v57 = vld [vmem:[%s704_s3 + $0x8] sm:$0xff]  ;;  %s422_s17 = sshll.u32 %s571_s16, 4  ;;  %s423_s17 = int_to_ptr.vmem [resolvable:$true] %s422_s17 }
   0xe   :  { %70 = vperm.xlu0 %536, %v44_v11   ;;  %v200_v20 = vld [vmem:[%s704_s3] sm:$0xff]  ;;  %v202_v58 = vld [vmem:[%s704_s3 + $0x10] sm:$0xff]  ;;  %v203_v59 = vld [vmem:[%s704_s3 + $0x18] sm:$0xff]  ;;  %s543_s18 = scalar_lea.vmem %s423_s17, 16  ;;  %s547_s19 = scalar_lea.vmem %s423_s17, 32 }
   0xf   :  { %75 = vperm.xlu1 %537, %v45_v12   ;;  %492 = vmatprep.mubr.msk.f32.mxu1 %vm228_vm1, %v200_v20  ;;  %p544_p0 = scmp.ne.s32.totalorder %s423_s17, %s543_s18  ;;  %p548_p1 = scmp.lt.s32.totalorder %s423_s17, %s423_s17 }
  0x10   :  { %473 = vmatmul.mubr.msk.bf16.gmra.mrb[4].mxu0 %vm114_vm0, %v542_v10  ;;  %p549_p2 = scmp.lt.s32.totalorder %s547_s19, %s543_s18 }
  0x11   :  { %506 = vmatprep.mubr.msk.f32.mxu0 %vm569_vm2, %v570_v61 }
  0x12   :  { %80 = vperm.xlu0 %536, %v46_v13   ;;  %p550_p3 = por %p549_p2, %p548_p1 }
  0x13   :  { %85 = vperm.xlu1 %537, %v47_v14  }
  0x14   :  { %p551_p4 = pnand %p550_p3, %p544_p0 }
  0x16   :  { %210 = vperm.xlu0 %536, %v204_v15  }
  0x17   :  { %215 = vperm.xlu1 %537, %v205_v16   ;;  %v330_v16 = vld [vmem:[%s706_s5] sm:$0x1] }
  0x1a   :  { %220 = vperm.xlu0 %536, %v206_v17   ;;  %v337_v17 = vlaneseq }
  0x1b   :  { %225 = vperm.xlu1 %537, %v207_v18  }
  0x1c   :  { %v338_v18 = vshrl.u32 %v337_v17, 7 }
  0x1e   :  { %334 = vperm.xlu0 %536, %v331_v19   ;;  %v339_v19 = vsub.s32 0, %v338_v18 }
  0x85   :  { %v51_v21 = vpop.permute.xlu0 %50 }
  0x86   :  { %v61_v22 = vpop.permute.xlu1 %60 }
  0x89   :  { %v56_v23 = vpop.permute.xlu0 %55 }
  0x8a   :  { %v66_v24 = vpop.permute.xlu1 %65 }
  0x8d   :  { %v71_v28 = vpop.permute.xlu0 %70 }
  0x8e   :  { %v76_v33 = vpop.permute.xlu1 %75 }
  0x91   :  { %v81_v40 = vpop.permute.xlu0 %80 }
  0x92   :  { %v86_v45 = vpop.permute.xlu1 %85 }
  0x95   :  { %v211_v63 = vpop.permute.xlu0 %210 }
  0x96   :  { %v216_v62 = vpop.permute.xlu1 %215 }
  0x99   :  { %v221_v8 = vpop.permute.xlu0 %220 }
  0x9a   :  { %v226_v5 = vpop.permute.xlu1 %225 }
  0x9d   :  { %v335_v20 = vpop.permute.xlu0 %334 }
  0xdb   :  { %v470_v25 = vpop.f32.mrb[0].mxu0 }
  0xdc   :  { %v170_v26 = vadd.f32 %v470_v25, %v61_v22  ;;  %v161_v27 = vpop.f32.mrb[1].mxu0 }
  0xdd   :  { %v162_v29 = vadd.f32 %v161_v27, %v51_v21  ;;  %v471_v30 = vpop.f32.mrb[2].mxu0  ;;  %v340_v21 = vrot.slane %v335_v20, %v339_v19 }
  0xde   :  { %v173_v31 = vadd.f32 %v471_v30, %v66_v24  ;;  %v164_v32 = vpop.f32.mrb[3].mxu0  ;;  %v194_v35 = vmax.f32 %v170_v26, 0.0 }
  0xdf   :  { %v165_v34 = vadd.f32 %v164_v32, %v56_v23  ;;  %v192_v37 = vmax.f32 %v162_v29, 0.0 }
  0xe0   :  { %v195_v36 = vmax.f32 %v173_v31, 0.0 }
  0xe1   :  { %v193_v38 = vmax.f32 %v165_v34, 0.0 }
  0xe2   :  { %v513_v39 = vpack.c.bf16 %v195_v36, %v194_v35 }
  0xe3   :  { %v474_v41 = vpop.f32.mrb[4].mxu0  ;;  %v509_v42 = vpack.c.bf16 %v193_v38, %v192_v37 }
  0xe4   :  { %v186_v43 = vadd.f32 %v474_v41, %v81_v40  ;;  %v177_v44 = vpop.f32.mrb[5].mxu0 }
  0xe5   :  { %v178_v46 = vadd.f32 %v177_v44, %v71_v28  ;;  %v475_v47 = vpop.f32.mrb[6].mxu0  ;;  %510 = vmatprep.subr.bf16.mxu1 %v509_v42 }
  0xe6   :  { %v189_v48 = vadd.f32 %v475_v47, %v86_v45  ;;  %v180_v49 = vpop.f32.mrb[7].mxu0  ;;  %512 = vmatpush3.bf16.msra.mxu1 %v509_v42  ;;  %v198_v51 = vmax.f32 %v186_v43, 0.0 }
  0xe7   :  { %v181_v50 = vadd.f32 %v180_v49, %v76_v33  ;;  %514 = vmatprep.subr.bf16.mxu1 %v513_v39  ;;  %v196_v53 = vmax.f32 %v178_v46, 0.0 }
  0xe8   :  { %v199_v52 = vmax.f32 %v189_v48, 0.0 }
  0xe9   :  { %v197_v54 = vmax.f32 %v181_v50, 0.0 }
  0xea   :  { %v521_v55 = vpack.c.bf16 %v199_v52, %v198_v51  ;;  %516 = vmatpush3.bf16.msra.mxu1 %v513_v39 }
  0xeb   :  { %v517_v56 = vpack.c.bf16 %v197_v54, %v196_v53 }
  0xed   :  { %518 = vmatprep.subr.bf16.mxu1 %v517_v56 }
  0xee   :  { %520 = vmatpush3.bf16.msra.mxu1 %v517_v56 }
  0xef   :  { %522 = vmatprep.subr.bf16.mxu1 %v521_v55 }
  0xf2   :  { %524 = vmatpush3.bf16.msra.mxu1 %v521_v55 }
  0xf5   :  { %493 = vmatmul.mubr.msk.f32.vlgmr.msra.gmra.mrb[0].mxu1 %vm228_vm1, %v201_v57 }
  0xf6   :  { %495 = vmatprep.mubr.msk.f32.mxu1 %vm228_vm1, %v202_v58 }
  0xf9   :  { %496 = vmatmul.mubr.msk.f32.gmra.mrb[2].mxu1 %vm228_vm1, %v203_v59 }
 0x1c8   :  { %v494_v0 = vpop.f32.mrb[0].mxu1 }
 0x1c9   :  { %v313_v1 = vadd.f32 %v494_v0, %v216_v62  ;;  %v307_v2 = vpop.f32.mrb[1].mxu1 }
 0x1ca   :  { %v308_v3 = vadd.f32 %v307_v2, %v211_v63 }
 0x1cb   :  { %v327_v4 = vmax.f32 %v313_v1, 0.0 }
 0x1cc   :  { %v326_v6 = vmax.f32 %v308_v3, 0.0  ;;  %v497_v7 = vpop.f32.mrb[2].mxu1 }
 0x1cd   :  { %v323_v9 = vadd.f32 %v497_v7, %v226_v5  ;;  %v317_v10 = vpop.f32.mrb[3].mxu1 }
 0x1ce   :  { %v526_v11 = vpack.c.bf16 %v327_v4, %v326_v6  ;;  %v318_v12 = vadd.f32 %v317_v10, %v221_v8 }
 0x1cf   :  { %v329_v13 = vmax.f32 %v323_v9, 0.0 }
 0x1d0   :  { %v328_v14 = vmax.f32 %v318_v12, 0.0  ;;  %527 = vmatpush3.bf16.msra.mxu0 %v526_v11 }
 0x1d1   :  { %528 = vmatprep.subr.bf16.mxu0 %v568_v60 }
 0x1d2   :  { %v529_v15 = vpack.c.bf16 %v329_v13, %v328_v14 }
 0x1d4   :  { %530 = vmatpush3.bf16.msra.mxu0 %v529_v15 }
 0x1d7   :  { %507 = vmatmul.mubr.msk.f32.vlgmr.msra.gmra.mrb[8].mxu0 %vm341_vm3, %v330_v16 }
 0x2aa   :  { %v411_v22 = vpop.f32.mrb[8].mxu0 }
 0x2ab   :  { %v412_v23 = vadd.f32 %v411_v22, %v340_v21  ;;  %v508_v24 = vpop.f32.mrb[9].mxu0 }
 0x2ad   :  { %415 = vst [vmem:[#allocation3] sm:$0x1] %v412_v23 }
 0x2ae   :  { %554 = shalt.err (!%p551_p4)
}
 0x2af   :  { %s555_s21 = scalar_lea.hbm %s708_s7, 16 }
 0x2b0   :  { %p556_p5 = scmp.ne.s32.totalorder %s708_s7, %s555_s21  ;;  %p559_p6 = scmp.lt.u32.totalorder %s555_s21, %s708_s7 }
 0x2b2   :  { %p561_p7 = pnand %p559_p6, %p556_p5 }
 0x2b4   :  { %564 = shalt.err (!%p561_p7)
}
 0x2b5   :  { %425 = dma.vmem_to_hbm [thread:$0]  %s423_s17, 16, %s708_s7, [#allocation4]  }
 0x2b6   :  { %565 = dma.done.wait [#allocation4], 16  }
 0x2b7   :  { %566 = vsyncadd [#allocation4], 4294967280 }
 0x2b8   :  { %429 = vsyncpa [#allocation4], 1 }

</bundles_post_ra>
